<compile_context>
chip_gen: v6e
topology: v6e:2x2x1
jax: 0.10.0
libtpu: 0.0.40
codegen_flags: <defaults>
</compile_context>

<pallas_src>
import jax
import jax.numpy as jnp
from jax.experimental import pallas as pl
from jax.experimental.pallas import tpu as pltpu


def _copy_kernel(x_ref, o_ref):
    # Straight VMEM tile copy: out[...] = in[...]
    o_ref[...] = x_ref[...]


_LANES = 128                              # lane-dense last dim
_MAX_TILE_BYTES = 8 * 1024 * 1024         # 8 MiB/tile: 4 buffers -> 32 MiB, fits v7x 64 MiB VMEM
_VMEM_LIMIT_BYTES = 48 * 1024 * 1024      # safe on v5e / v6e (128 MiB) and v7x (64 MiB)


def _choose_block_rows(rows, itemsize):
    """Pick a sublane-aligned block height giving >=2 balanced grid steps (when possible),
    capped so a single tile never exceeds _MAX_TILE_BYTES."""
    max_rows = max(8, (_MAX_TILE_BYTES // (_LANES * itemsize)) // 8 * 8)
    if rows < 16:
        # Too small to split into two mult-of-8 blocks; single (full-extent) block.
        return rows
    # Even number of steps so both v7x TensorCores get (nearly) equal work.
    n_steps = max(2, pl.cdiv(rows, max_rows))
    if n_steps % 2:
        n_steps += 1
    block = pl.cdiv(rows, n_steps)
    block = max(8, ((block + 7) // 8) * 8)   # sublane (8) alignment
    return min(block, max_rows)


def _identity_copy_2d(x2d):
    """Lane-dense tiled copy of a (rows, 128) slab through VMEM."""
    rows, lanes = x2d.shape
    block_rows = _choose_block_rows(rows, x2d.dtype.itemsize)
    grid = (pl.cdiv(rows, block_rows),)

    return pl.pallas_call(
        _copy_kernel,
        out_shape=jax.ShapeDtypeStruct(x2d.shape, x2d.dtype),
        grid_spec=pltpu.PrefetchScalarGridSpec(
            num_scalar_prefetch=0,
            grid=grid,
            in_specs=[pl.BlockSpec((block_rows, lanes), lambda i: (i, 0))],
            out_specs=pl.BlockSpec((block_rows, lanes), lambda i: (i, 0)),
        ),
        compiler_params=pltpu.CompilerParams(
            dimension_semantics=("parallel",),        # shards grid steps across TCs on v7x
            vmem_limit_bytes=_VMEM_LIMIT_BYTES,
        ),
        cost_estimate=pl.CostEstimate(
            flops=0,
            transcendentals=0,
            bytes_accessed=2 * x2d.size * x2d.dtype.itemsize,
        ),
    )(x2d)


def _identity_copy_tail(tail2d):
    """Tiny (1, t<128) full-extent block copy for the non-128-aligned remainder."""
    return pl.pallas_call(
        _copy_kernel,
        out_shape=jax.ShapeDtypeStruct(tail2d.shape, tail2d.dtype),
        in_specs=[pl.BlockSpec(tail2d.shape, lambda: (0, 0))],
        out_specs=pl.BlockSpec(tail2d.shape, lambda: (0, 0)),
    )(tail2d)


@jax.jit  # NOTE: intentionally no donate_argnums -- caller keeps its input buffer valid.
def _identity_impl(x):
    total = x.size
    if total % _LANES == 0:
        # Lane-dense path: flatten NCHW -> (rows, 128), copy, reshape back (bitcasts).
        rows = total // _LANES
        y2d = _identity_copy_2d(x.reshape(rows, _LANES))
        return y2d.reshape(x.shape)

    # Rare fallback: 128-aligned prefix through the tiled path, tiny tail block, reassemble.
    # (The concatenate adds one XLA copy, but avoids staging the whole array in VMEM.)
    flat = x.reshape(total)
    main = (total // _LANES) * _LANES
    parts = []
    if main > 0:
        y_main = _identity_copy_2d(flat[:main].reshape(main // _LANES, _LANES))
        parts.append(y_main.reshape(main))
    tail = total - main
    if tail > 0:
        y_tail = _identity_copy_tail(flat[main:].reshape(1, tail))
        parts.append(y_tail.reshape(tail))
    return jnp.concatenate(parts).reshape(x.shape)


def identity_noise(encoded_and_cover):
    """Pallas equivalent of Identity.forward: returns encoded_and_cover[0].

    encoded_and_cover: (encoded, cover) tuple/list of NCHW arrays; cover is unused.
    """
    return _identity_impl(encoded_and_cover[0])


if __name__ == "__main__":
    key = jax.random.PRNGKey(0)
    k_enc, k_cov = jax.random.split(key)

    # Small NCHW shapes: batch=2, channels=4, spatial=16
    encoded = jax.random.normal(k_enc, (2, 4, 16, 16), dtype=jnp.float32)
    cover = jax.random.normal(k_cov, (2, 4, 16, 16), dtype=jnp.float32)

    out = identity_noise((encoded, cover))
    out = jax.block_until_ready(out)

    assert out.shape == encoded.shape
    assert out.dtype == encoded.dtype
    assert bool(jnp.array_equal(out, encoded))

    print("KERNEL_OK")
</pallas_src>

<mosaic_0001>
module attributes {stable_mosaic.version = 11 : i64} {
  func.func @_copy_kernel(%arg0: i32, %arg1: memref<8x128xf32, #tpu.memory_space<vmem>>, %arg2: memref<8x128xf32, #tpu.memory_space<vmem>>) attributes {dimension_semantics = [#tpu.dimension_semantics<parallel>], iteration_bounds = array<i64: 2>, scalar_prefetch = 0 : i64, scratch_operands = 0 : i64, tpu.core_type = #tpu.core_type<tc>, window_params = [{transform_indices = @transform_0, window_bounds = array<i64: 8, 128>}, {transform_indices = @transform_1, window_bounds = array<i64: 8, 128>}]} {
    %c0 = arith.constant 0 : index
    %c0_0 = arith.constant 0 : index
    %0 = vector.load %arg1[%c0, %c0_0] : memref<8x128xf32, #tpu.memory_space<vmem>>, vector<8x128xf32>
    %c0_1 = arith.constant 0 : index
    %c0_2 = arith.constant 0 : index
    %1 = vector.load %arg2[%c0_1, %c0_2] : memref<8x128xf32, #tpu.memory_space<vmem>>, vector<8x128xf32>
    tpu.vector_store %arg2[%c0_1, %c0_2], %0 {strides = array<i32>} : memref<8x128xf32, #tpu.memory_space<vmem>>, vector<8x128xf32>,
    return
  }
  func.func @transform_0(%arg0: i32) -> (i32, i32) {
    %c0_i32 = arith.constant 0 : i32
    %c0_i32_0 = arith.constant 0 : i32
    return %arg0, %c0_i32 : i32, i32
  }
  func.func @transform_1(%arg0: i32) -> (i32, i32) {
    %c0_i32 = arith.constant 0 : i32
    %c0_i32_0 = arith.constant 0 : i32
    return %arg0, %c0_i32 : i32, i32
  }
}

</mosaic_0001>

<bundles_post_ra>
// kernel: _identity_impl.1
= control target key start
LH: loop header
LB: loop body
LE: loop exit
PB: predicated region body
PF: predicated region fallthrough
CT: control target
= control target key end

     0   :  { %s188_s6 = smov 0   ;;  %s208_s0 = inlined_call_operand.vmem [shape: f32[16,128], index: 0, kind: input, shape index: {}]   ;;  %s209_s1 = inlined_call_operand.vmem [shape: f32[16,128], index: 1, kind: output, shape index: {}]  }
   0x1 LB: > { %s167_s7 = sadd.s32 4294967295, %s190_s6   ;;  %p171_p0 = scmp.ge.s32.totalorder %s190_s6, 1  ;;  %s190_s6 = sphi %s188_s6, %s11_s6  }
   0x2   : > { %p86_p1 = scmp.lt.s32.totalorder %s190_s6, 3 }
   0x4   : > { %p87_p2 = pnand %p171_p0, %p86_p1 }
   0x5   : > { %p104_p3 = scmp.lt.s32.totalorder (!%p87_p2), %s167_s7, 1 }
   0x6   : > { %90 = sbr.rel (%p87_p2) target bundleno = 16 (0x10), region = 24 }
   0xb   : > { %s211_s7 = smov (!%p104_p3, %s167_s7), 1 }
   0xc   : > { %s172_s8 = sshll.u32 %s211_s7, 3 }
   0xd   : > { %s107_s11 = scalar_lea.vmem %s208_s0, %s172_s8  ;;  %s111_s14 = scalar_lea.vmem %s209_s1, %s172_s8 }
   0xe   : > { %v112_v0 = vld [vmem:[%s107_s11] sm:$0xff] }
   0xf   : > { %113 = vst [vmem:[%s111_s14] sm:$0xff] %v112_v0 }
  0x10 PF: > { %s11_s6 = sadd.s32 1, %s190_s6  }
  0x11   : > { %p8_p4 = scmp.ge.s32.totalorder %s11_s6, 4  }
  0x13   :  { %10 = sbr.rel (!%p8_p4) target bundleno = 1 (0x1), region = 54 }

</bundles_post_ra>
